<compile_context>
chip_gen: v7x
topology: tpu7x:2x2x1
jax: 0.10.0
libtpu: 0.0.40
codegen_flags: <defaults>
</compile_context>

<pallas_src>
import functools

import jax
import jax.numpy as jnp
from jax import lax
from jax.experimental import pallas as pl
from jax.experimental.pallas import tpu as pltpu


def _geometry_skill_kernel(
    h_ref,        # [B, N, H]
    wm_ref,       # [H, M]    message weight
    bm_ref,       # [1, M]    message bias
    wuh_ref,      # [H, H]    update weight (node-state part)
    wum_ref,      # [M, H]    update weight (aggregated-message part)
    bu_ref,       # [1, H]    update bias
    wr_ref,       # [N, H, O] readout weight (pre-reshaped from [N*H, O])
    br_ref,       # [1, O]    readout bias
    out_ref,      # [B, O]
    *,
    layer_num: int,
    batch: int,
    node_num: int,
):
    B, N = batch, node_num
    H = h_ref.shape[-1]
    M = wm_ref.shape[-1]

    # Collapse batch*node once; lane dim (H) is preserved so this is a pure
    # leading-dim merge with no relayout.
    h2d = h_ref[...].reshape(B * N, H).astype(jnp.float32)

    wm = wm_ref[...]
    wuh = wuh_ref[...]
    wum = wum_ref[...]

    # Hoisted bias broadcasts (reused across all unrolled layers).
    bm_b = jnp.broadcast_to(bm_ref[...], (B * N, M))
    bu_b = jnp.broadcast_to(bu_ref[...], (B * N, H))
    br = br_ref[...]

    def mp_step(_, h2d):
        # message: one (B*N, H) @ (H, M) matmul + ReLU
        m = jnp.dot(h2d, wm, preferred_element_type=jnp.float32) + bm_b
        m = jnp.maximum(m, 0.0)
        # 'AVG' aggregation over all nodes (A is None -> fully connected)
        agg = jnp.mean(m.reshape(B, N, M), axis=1)                    # [B, M]
        # update: tanh(h @ Wuh + agg @ Wum + bu)
        agg_h = jnp.dot(agg, wum, preferred_element_type=jnp.float32)  # [B, H]
        agg_bn = jnp.broadcast_to(agg_h[:, None, :], (B, N, H)).reshape(B * N, H)
        upd = jnp.dot(h2d, wuh, preferred_element_type=jnp.float32) + agg_bn + bu_b
        return jnp.tanh(upd)

    h2d = lax.fori_loop(0, layer_num, mp_step, h2d, unroll=True)

    # readout: flatten_nodes(h) @ W_ro + b_ro, implemented as an unrolled sum
    # of N (B, H) @ (H, O) matmuls (contraction on the lane dim -> no relayout).
    h3d = h2d.reshape(B, N, H)
    acc = jnp.dot(h3d[:, 0, :], wr_ref[0], preferred_element_type=jnp.float32)
    for n in range(1, N):
        acc = acc + jnp.dot(h3d[:, n, :], wr_ref[n],
                            preferred_element_type=jnp.float32)

    out_ref[...] = (acc + br).astype(out_ref.dtype)


def geometry_skill_basis_forward(h_init, params, *, layer_num):
    """h_init: [B, N, H] float32 -> [B, output_dim] float32."""
    B, N, H = h_init.shape
    O = params["b_ro"].shape[-1]
    wr3 = params["w_ro"].reshape(N, H, O)  # glue reshape outside the kernel

    vmem = pl.BlockSpec(memory_space=pltpu.MemorySpace.VMEM)
    kernel = functools.partial(
        _geometry_skill_kernel, layer_num=layer_num, batch=B, node_num=N)

    return pl.pallas_call(
        kernel,
        out_shape=jax.ShapeDtypeStruct((B, O), jnp.float32),
        in_specs=[vmem] * 8,
        out_specs=vmem,
    )(
        h_init,
        params["w_msg"], params["b_msg"],
        params["w_upd_h"], params["w_upd_m"], params["b_upd"],
        wr3, params["b_ro"],
    )


def init_params(key, node_num, h_dim, msg_dim, output_dim):
    """Deterministic synthetic parameters (nn.Linear-style uniform init)."""
    ks = jax.random.split(key, 8)

    def lin_w(k, fan_in, shape):
        bound = 1.0 / jnp.sqrt(fan_in)
        return jax.random.uniform(k, shape, jnp.float32, -bound, bound)

    return {
        "w_msg":   lin_w(ks[0], h_dim, (h_dim, msg_dim)),
        "b_msg":   lin_w(ks[1], h_dim, (1, msg_dim)),
        "w_upd_h": lin_w(ks[2], h_dim + msg_dim, (h_dim, h_dim)),
        "w_upd_m": lin_w(ks[3], h_dim + msg_dim, (msg_dim, h_dim)),
        "b_upd":   lin_w(ks[4], h_dim + msg_dim, (1, h_dim)),
        "w_ro":    lin_w(ks[5], node_num * h_dim, (node_num * h_dim, output_dim)),
        "b_ro":    lin_w(ks[6], node_num * h_dim, (1, output_dim)),
    }


def reference_forward(h, p, layer_num):
    """Pure-JAX reference for correctness checking."""
    for _ in range(layer_num):
        m = jnp.maximum(jnp.einsum("bnh,hm->bnm", h, p["w_msg"]) + p["b_msg"], 0.0)
        agg = jnp.mean(m, axis=1, keepdims=True)
        h = jnp.tanh(
            jnp.einsum("bnh,hk->bnk", h, p["w_upd_h"])
            + jnp.einsum("bnm,mk->bnk", agg, p["w_upd_m"])
            + p["b_upd"]
        )
    B, N, H = h.shape
    return h.reshape(B, N * H) @ p["w_ro"] + p["b_ro"]


if __name__ == "__main__":
    # Small shapes consistent with the module signature.
    batch, node_num, layer_num = 2, 8, 3
    msg_dim, h_dim, output_dim = 16, 32, 32

    key = jax.random.PRNGKey(0)
    k_in, k_par = jax.random.split(key)

    h_init = jax.random.normal(k_in, (batch, node_num, h_dim), jnp.float32)
    params = init_params(k_par, node_num, h_dim, msg_dim, output_dim)

    out = geometry_skill_basis_forward(h_init, params, layer_num=layer_num)
    out = jax.block_until_ready(out)

    ref = reference_forward(h_init, params, layer_num)
    assert out.shape == (batch, output_dim)
    assert jnp.allclose(out, ref, atol=1e-4, rtol=1e-4), "mismatch vs reference"

    print("KERNEL_OK")
</pallas_src>

<mosaic_0001>
module attributes {stable_mosaic.version = 11 : i64} {
  func.func @_geometry_skill_kernel(%arg0: memref<2x8x32xf32, #tpu.memory_space<vmem>>, %arg1: memref<32x16xf32, #tpu.memory_space<vmem>>, %arg2: memref<1x16xf32, #tpu.memory_space<vmem>>, %arg3: memref<32x32xf32, #tpu.memory_space<vmem>>, %arg4: memref<16x32xf32, #tpu.memory_space<vmem>>, %arg5: memref<1x32xf32, #tpu.memory_space<vmem>>, %arg6: memref<8x32x32xf32, #tpu.memory_space<vmem>>, %arg7: memref<1x32xf32, #tpu.memory_space<vmem>>, %arg8: memref<2x32xf32, #tpu.memory_space<vmem>>) attributes {dimension_semantics = [], scalar_prefetch = 0 : i64, scratch_operands = 0 : i64, tpu.core_type = #tpu.core_type<tc>} {
    %c0 = arith.constant 0 : index
    %c0_0 = arith.constant 0 : index
    %c0_1 = arith.constant 0 : index
    %0 = vector.load %arg0[%c0, %c0_0, %c0_1] : memref<2x8x32xf32, #tpu.memory_space<vmem>>, vector<2x8x32xf32>
    %1 = vector.shape_cast %0 : vector<2x8x32xf32> to vector<16x32xf32>
    %c0_2 = arith.constant 0 : index
    %c0_3 = arith.constant 0 : index
    %2 = vector.load %arg1[%c0_2, %c0_3] : memref<32x16xf32, #tpu.memory_space<vmem>>, vector<32x16xf32>
    %c0_4 = arith.constant 0 : index
    %c0_5 = arith.constant 0 : index
    %3 = vector.load %arg3[%c0_4, %c0_5] : memref<32x32xf32, #tpu.memory_space<vmem>>, vector<32x32xf32>
    %c0_6 = arith.constant 0 : index
    %c0_7 = arith.constant 0 : index
    %4 = vector.load %arg4[%c0_6, %c0_7] : memref<16x32xf32, #tpu.memory_space<vmem>>, vector<16x32xf32>
    %c0_8 = arith.constant 0 : index
    %c0_9 = arith.constant 0 : index
    %5 = vector.load %arg2[%c0_8, %c0_9] : memref<1x16xf32, #tpu.memory_space<vmem>>, vector<1x16xf32>
    %6 = vector.shape_cast %5 : vector<1x16xf32> to vector<1x16xf32>
    %7 = vector.broadcast %6 : vector<1x16xf32> to vector<16x16xf32>
    %c0_10 = arith.constant 0 : index
    %c0_11 = arith.constant 0 : index
    %8 = vector.load %arg5[%c0_10, %c0_11] : memref<1x32xf32, #tpu.memory_space<vmem>>, vector<1x32xf32>
    %9 = vector.shape_cast %8 : vector<1x32xf32> to vector<1x32xf32>
    %10 = vector.broadcast %9 : vector<1x32xf32> to vector<16x32xf32>
    %c0_12 = arith.constant 0 : index
    %c0_13 = arith.constant 0 : index
    %11 = vector.load %arg7[%c0_12, %c0_13] : memref<1x32xf32, #tpu.memory_space<vmem>>, vector<1x32xf32>
    %c0_i32 = arith.constant 0 : i32
    %cst = arith.constant dense<0.000000e+00> : vector<16x16xf32>
    %12 = tpu.matmul %1, %2, %cst {dimension_numbers = #tpu.dot_dimension_numbers<[1], [0], [0], [1], [0, 0, 1, 1], [], []>} : vector<16x32xf32>, vector<32x16xf32>, vector<16x16xf32> -> vector<16x16xf32>
    %13 = arith.addf %12, %7 : vector<16x16xf32>
    %cst_14 = arith.constant 0.000000e+00 : f32
    %14 = vector.broadcast %cst_14 : f32 to vector<16x16xf32>
    %15 = arith.maximumf %13, %14 : vector<16x16xf32>
    %16 = vector.shape_cast %15 : vector<16x16xf32> to vector<2x8x16xf32>
    %cst_15 = arith.constant dense<0.000000e+00> : vector<2x16xf32>
    %17 = vector.multi_reduction <add>, %16, %cst_15 [1] : vector<2x8x16xf32> to vector<2x16xf32>
    %cst_16 = arith.constant 8.000000e+00 : f32
    %18 = vector.broadcast %cst_16 : f32 to vector<2x16xf32>
    %19 = arith.divf %17, %18 : vector<2x16xf32>
    %cst_17 = arith.constant dense<0.000000e+00> : vector<2x32xf32>
    %20 = tpu.matmul %19, %4, %cst_17 {dimension_numbers = #tpu.dot_dimension_numbers<[1], [0], [0], [1], [0, 0, 1, 1], [], []>} : vector<2x16xf32>, vector<16x32xf32>, vector<2x32xf32> -> vector<2x32xf32>
    %21 = vector.shape_cast %20 : vector<2x32xf32> to vector<2x1x32xf32>
    %22 = vector.shape_cast %21 : vector<2x1x32xf32> to vector<2x1x32xf32>
    %23 = vector.broadcast %22 : vector<2x1x32xf32> to vector<2x8x32xf32>
    %24 = vector.shape_cast %23 : vector<2x8x32xf32> to vector<16x32xf32>
    %cst_18 = arith.constant dense<0.000000e+00> : vector<16x32xf32>
    %25 = tpu.matmul %1, %3, %cst_18 {dimension_numbers = #tpu.dot_dimension_numbers<[1], [0], [0], [1], [0, 0, 1, 1], [], []>} : vector<16x32xf32>, vector<32x32xf32>, vector<16x32xf32> -> vector<16x32xf32>
    %26 = arith.addf %25, %24 : vector<16x32xf32>
    %27 = arith.addf %26, %10 : vector<16x32xf32>
    %28 = math.tanh %27 : vector<16x32xf32>
    %c1_i32 = arith.constant 1 : i32
    %cst_19 = arith.constant dense<0.000000e+00> : vector<16x16xf32>
    %29 = tpu.matmul %28, %2, %cst_19 {dimension_numbers = #tpu.dot_dimension_numbers<[1], [0], [0], [1], [0, 0, 1, 1], [], []>} : vector<16x32xf32>, vector<32x16xf32>, vector<16x16xf32> -> vector<16x16xf32>
    %30 = arith.addf %29, %7 : vector<16x16xf32>
    %cst_20 = arith.constant 0.000000e+00 : f32
    %31 = vector.broadcast %cst_20 : f32 to vector<16x16xf32>
    %32 = arith.maximumf %30, %31 : vector<16x16xf32>
    %33 = vector.shape_cast %32 : vector<16x16xf32> to vector<2x8x16xf32>
    %cst_21 = arith.constant dense<0.000000e+00> : vector<2x16xf32>
    %34 = vector.multi_reduction <add>, %33, %cst_21 [1] : vector<2x8x16xf32> to vector<2x16xf32>
    %cst_22 = arith.constant 8.000000e+00 : f32
    %35 = vector.broadcast %cst_22 : f32 to vector<2x16xf32>
    %36 = arith.divf %34, %35 : vector<2x16xf32>
    %cst_23 = arith.constant dense<0.000000e+00> : vector<2x32xf32>
    %37 = tpu.matmul %36, %4, %cst_23 {dimension_numbers = #tpu.dot_dimension_numbers<[1], [0], [0], [1], [0, 0, 1, 1], [], []>} : vector<2x16xf32>, vector<16x32xf32>, vector<2x32xf32> -> vector<2x32xf32>
    %38 = vector.shape_cast %37 : vector<2x32xf32> to vector<2x1x32xf32>
    %39 = vector.shape_cast %38 : vector<2x1x32xf32> to vector<2x1x32xf32>
    %40 = vector.broadcast %39 : vector<2x1x32xf32> to vector<2x8x32xf32>
    %41 = vector.shape_cast %40 : vector<2x8x32xf32> to vector<16x32xf32>
    %cst_24 = arith.constant dense<0.000000e+00> : vector<16x32xf32>
    %42 = tpu.matmul %28, %3, %cst_24 {dimension_numbers = #tpu.dot_dimension_numbers<[1], [0], [0], [1], [0, 0, 1, 1], [], []>} : vector<16x32xf32>, vector<32x32xf32>, vector<16x32xf32> -> vector<16x32xf32>
    %43 = arith.addf %42, %41 : vector<16x32xf32>
    %44 = arith.addf %43, %10 : vector<16x32xf32>
    %45 = math.tanh %44 : vector<16x32xf32>
    %c2_i32 = arith.constant 2 : i32
    %cst_25 = arith.constant dense<0.000000e+00> : vector<16x16xf32>
    %46 = tpu.matmul %45, %2, %cst_25 {dimension_numbers = #tpu.dot_dimension_numbers<[1], [0], [0], [1], [0, 0, 1, 1], [], []>} : vector<16x32xf32>, vector<32x16xf32>, vector<16x16xf32> -> vector<16x16xf32>
    %47 = arith.addf %46, %7 : vector<16x16xf32>
    %cst_26 = arith.constant 0.000000e+00 : f32
    %48 = vector.broadcast %cst_26 : f32 to vector<16x16xf32>
    %49 = arith.maximumf %47, %48 : vector<16x16xf32>
    %50 = vector.shape_cast %49 : vector<16x16xf32> to vector<2x8x16xf32>
    %cst_27 = arith.constant dense<0.000000e+00> : vector<2x16xf32>
    %51 = vector.multi_reduction <add>, %50, %cst_27 [1] : vector<2x8x16xf32> to vector<2x16xf32>
    %cst_28 = arith.constant 8.000000e+00 : f32
    %52 = vector.broadcast %cst_28 : f32 to vector<2x16xf32>
    %53 = arith.divf %51, %52 : vector<2x16xf32>
    %cst_29 = arith.constant dense<0.000000e+00> : vector<2x32xf32>
    %54 = tpu.matmul %53, %4, %cst_29 {dimension_numbers = #tpu.dot_dimension_numbers<[1], [0], [0], [1], [0, 0, 1, 1], [], []>} : vector<2x16xf32>, vector<16x32xf32>, vector<2x32xf32> -> vector<2x32xf32>
    %55 = vector.shape_cast %54 : vector<2x32xf32> to vector<2x1x32xf32>
    %56 = vector.shape_cast %55 : vector<2x1x32xf32> to vector<2x1x32xf32>
    %57 = vector.broadcast %56 : vector<2x1x32xf32> to vector<2x8x32xf32>
    %58 = vector.shape_cast %57 : vector<2x8x32xf32> to vector<16x32xf32>
    %cst_30 = arith.constant dense<0.000000e+00> : vector<16x32xf32>
    %59 = tpu.matmul %45, %3, %cst_30 {dimension_numbers = #tpu.dot_dimension_numbers<[1], [0], [0], [1], [0, 0, 1, 1], [], []>} : vector<16x32xf32>, vector<32x32xf32>, vector<16x32xf32> -> vector<16x32xf32>
    %60 = arith.addf %59, %58 : vector<16x32xf32>
    %61 = arith.addf %60, %10 : vector<16x32xf32>
    %62 = math.tanh %61 : vector<16x32xf32>
    %63 = vector.shape_cast %62 : vector<16x32xf32> to vector<2x8x32xf32>
    %64 = vector.extract_strided_slice %63 {offsets = [0, 0, 0], sizes = [2, 1, 32], strides = [1, 1, 1]} : vector<2x8x32xf32> to vector<2x1x32xf32>
    %65 = vector.shape_cast %64 : vector<2x1x32xf32> to vector<2x32xf32>
    %c0_31 = arith.constant 0 : index
    %c0_32 = arith.constant 0 : index
    %c0_33 = arith.constant 0 : index
    %66 = vector.load %arg6[%c0_31, %c0_32, %c0_33] : memref<8x32x32xf32, #tpu.memory_space<vmem>>, vector<1x32x32xf32>
    %67 = vector.shape_cast %66 : vector<1x32x32xf32> to vector<32x32xf32>
    %cst_34 = arith.constant dense<0.000000e+00> : vector<2x32xf32>
    %68 = tpu.matmul %65, %67, %cst_34 {dimension_numbers = #tpu.dot_dimension_numbers<[1], [0], [0], [1], [0, 0, 1, 1], [], []>} : vector<2x32xf32>, vector<32x32xf32>, vector<2x32xf32> -> vector<2x32xf32>
    %69 = vector.extract_strided_slice %63 {offsets = [0, 1, 0], sizes = [2, 1, 32], strides = [1, 1, 1]} : vector<2x8x32xf32> to vector<2x1x32xf32>
    %70 = vector.shape_cast %69 : vector<2x1x32xf32> to vector<2x32xf32>
    %c1 = arith.constant 1 : index
    %c0_35 = arith.constant 0 : index
    %c0_36 = arith.constant 0 : index
    %71 = vector.load %arg6[%c1, %c0_35, %c0_36] : memref<8x32x32xf32, #tpu.memory_space<vmem>>, vector<1x32x32xf32>
    %72 = vector.shape_cast %71 : vector<1x32x32xf32> to vector<32x32xf32>
    %cst_37 = arith.constant dense<0.000000e+00> : vector<2x32xf32>
    %73 = tpu.matmul %70, %72, %cst_37 {dimension_numbers = #tpu.dot_dimension_numbers<[1], [0], [0], [1], [0, 0, 1, 1], [], []>} : vector<2x32xf32>, vector<32x32xf32>, vector<2x32xf32> -> vector<2x32xf32>
    %74 = arith.addf %68, %73 : vector<2x32xf32>
    %75 = vector.extract_strided_slice %63 {offsets = [0, 2, 0], sizes = [2, 1, 32], strides = [1, 1, 1]} : vector<2x8x32xf32> to vector<2x1x32xf32>
    %76 = vector.shape_cast %75 : vector<2x1x32xf32> to vector<2x32xf32>
    %c2 = arith.constant 2 : index
    %c0_38 = arith.constant 0 : index
    %c0_39 = arith.constant 0 : index
    %77 = vector.load %arg6[%c2, %c0_38, %c0_39] : memref<8x32x32xf32, #tpu.memory_space<vmem>>, vector<1x32x32xf32>
    %78 = vector.shape_cast %77 : vector<1x32x32xf32> to vector<32x32xf32>
    %cst_40 = arith.constant dense<0.000000e+00> : vector<2x32xf32>
    %79 = tpu.matmul %76, %78, %cst_40 {dimension_numbers = #tpu.dot_dimension_numbers<[1], [0], [0], [1], [0, 0, 1, 1], [], []>} : vector<2x32xf32>, vector<32x32xf32>, vector<2x32xf32> -> vector<2x32xf32>
    %80 = arith.addf %74, %79 : vector<2x32xf32>
    %81 = vector.extract_strided_slice %63 {offsets = [0, 3, 0], sizes = [2, 1, 32], strides = [1, 1, 1]} : vector<2x8x32xf32> to vector<2x1x32xf32>
    %82 = vector.shape_cast %81 : vector<2x1x32xf32> to vector<2x32xf32>
    %c3 = arith.constant 3 : index
    %c0_41 = arith.constant 0 : index
    %c0_42 = arith.constant 0 : index
    %83 = vector.load %arg6[%c3, %c0_41, %c0_42] : memref<8x32x32xf32, #tpu.memory_space<vmem>>, vector<1x32x32xf32>
    %84 = vector.shape_cast %83 : vector<1x32x32xf32> to vector<32x32xf32>
    %cst_43 = arith.constant dense<0.000000e+00> : vector<2x32xf32>
    %85 = tpu.matmul %82, %84, %cst_43 {dimension_numbers = #tpu.dot_dimension_numbers<[1], [0], [0], [1], [0, 0, 1, 1], [], []>} : vector<2x32xf32>, vector<32x32xf32>, vector<2x32xf32> -> vector<2x32xf32>
    %86 = arith.addf %80, %85 : vector<2x32xf32>
    %87 = vector.extract_strided_slice %63 {offsets = [0, 4, 0], sizes = [2, 1, 32], strides = [1, 1, 1]} : vector<2x8x32xf32> to vector<2x1x32xf32>
    %88 = vector.shape_cast %87 : vector<2x1x32xf32> to vector<2x32xf32>
    %c4 = arith.constant 4 : index
    %c0_44 = arith.constant 0 : index
    %c0_45 = arith.constant 0 : index
    %89 = vector.load %arg6[%c4, %c0_44, %c0_45] : memref<8x32x32xf32, #tpu.memory_space<vmem>>, vector<1x32x32xf32>
    %90 = vector.shape_cast %89 : vector<1x32x32xf32> to vector<32x32xf32>
    %cst_46 = arith.constant dense<0.000000e+00> : vector<2x32xf32>
    %91 = tpu.matmul %88, %90, %cst_46 {dimension_numbers = #tpu.dot_dimension_numbers<[1], [0], [0], [1], [0, 0, 1, 1], [], []>} : vector<2x32xf32>, vector<32x32xf32>, vector<2x32xf32> -> vector<2x32xf32>
    %92 = arith.addf %86, %91 : vector<2x32xf32>
    %93 = vector.extract_strided_slice %63 {offsets = [0, 5, 0], sizes = [2, 1, 32], strides = [1, 1, 1]} : vector<2x8x32xf32> to vector<2x1x32xf32>
    %94 = vector.shape_cast %93 : vector<2x1x32xf32> to vector<2x32xf32>
    %c5 = arith.constant 5 : index
    %c0_47 = arith.constant 0 : index
    %c0_48 = arith.constant 0 : index
    %95 = vector.load %arg6[%c5, %c0_47, %c0_48] : memref<8x32x32xf32, #tpu.memory_space<vmem>>, vector<1x32x32xf32>
    %96 = vector.shape_cast %95 : vector<1x32x32xf32> to vector<32x32xf32>
    %cst_49 = arith.constant dense<0.000000e+00> : vector<2x32xf32>
    %97 = tpu.matmul %94, %96, %cst_49 {dimension_numbers = #tpu.dot_dimension_numbers<[1], [0], [0], [1], [0, 0, 1, 1], [], []>} : vector<2x32xf32>, vector<32x32xf32>, vector<2x32xf32> -> vector<2x32xf32>
    %98 = arith.addf %92, %97 : vector<2x32xf32>
    %99 = vector.extract_strided_slice %63 {offsets = [0, 6, 0], sizes = [2, 1, 32], strides = [1, 1, 1]} : vector<2x8x32xf32> to vector<2x1x32xf32>
    %100 = vector.shape_cast %99 : vector<2x1x32xf32> to vector<2x32xf32>
    %c6 = arith.constant 6 : index
    %c0_50 = arith.constant 0 : index
    %c0_51 = arith.constant 0 : index
    %101 = vector.load %arg6[%c6, %c0_50, %c0_51] : memref<8x32x32xf32, #tpu.memory_space<vmem>>, vector<1x32x32xf32>
    %102 = vector.shape_cast %101 : vector<1x32x32xf32> to vector<32x32xf32>
    %cst_52 = arith.constant dense<0.000000e+00> : vector<2x32xf32>
    %103 = tpu.matmul %100, %102, %cst_52 {dimension_numbers = #tpu.dot_dimension_numbers<[1], [0], [0], [1], [0, 0, 1, 1], [], []>} : vector<2x32xf32>, vector<32x32xf32>, vector<2x32xf32> -> vector<2x32xf32>
    %104 = arith.addf %98, %103 : vector<2x32xf32>
    %105 = vector.extract_strided_slice %63 {offsets = [0, 7, 0], sizes = [2, 1, 32], strides = [1, 1, 1]} : vector<2x8x32xf32> to vector<2x1x32xf32>
    %106 = vector.shape_cast %105 : vector<2x1x32xf32> to vector<2x32xf32>
    %c7 = arith.constant 7 : index
    %c0_53 = arith.constant 0 : index
    %c0_54 = arith.constant 0 : index
    %107 = vector.load %arg6[%c7, %c0_53, %c0_54] : memref<8x32x32xf32, #tpu.memory_space<vmem>>, vector<1x32x32xf32>
    %108 = vector.shape_cast %107 : vector<1x32x32xf32> to vector<32x32xf32>
    %cst_55 = arith.constant dense<0.000000e+00> : vector<2x32xf32>
    %109 = tpu.matmul %106, %108, %cst_55 {dimension_numbers = #tpu.dot_dimension_numbers<[1], [0], [0], [1], [0, 0, 1, 1], [], []>} : vector<2x32xf32>, vector<32x32xf32>, vector<2x32xf32> -> vector<2x32xf32>
    %110 = arith.addf %104, %109 : vector<2x32xf32>
    %111 = vector.broadcast %11 : vector<1x32xf32> to vector<2x32xf32>
    %112 = arith.addf %110, %111 : vector<2x32xf32>
    %c0_56 = arith.constant 0 : index
    %c0_57 = arith.constant 0 : index
    %113 = vector.load %arg8[%c0_56, %c0_57] : memref<2x32xf32, #tpu.memory_space<vmem>>, vector<2x32xf32>
    tpu.vector_store %arg8[%c0_56, %c0_57], %112 {strides = array<i32>} : memref<2x32xf32, #tpu.memory_space<vmem>>, vector<2x32xf32>,
    return
  }
}

</mosaic_0001>

<bundles_post_ra>
// kernel: tpu_custom_call.1
= control target key start
LH: loop header
LB: loop body
LE: loop exit
PB: predicated region body
PF: predicated region fallthrough
CT: control target
= control target key end

     0   :  { %13 = vsyncpa [#allocation3], 0  ;;  %s2383_s0 = inlined_call_operand.vmem [shape: f32[2,8,32], index: 0, kind: input, shape index: {}]   ;;  %s2384_s1 = inlined_call_operand.vmem [shape: f32[32,16], index: 1, kind: input, shape index: {}]   ;;  %s2385_s2 = inlined_call_operand.vmem [shape: f32[1,16], index: 2, kind: input, shape index: {}]   ;;  %s2386_s3 = inlined_call_operand.vmem [shape: f32[32,32], index: 3, kind: input, shape index: {}]   ;;  %s2387_s4 = inlined_call_operand.hbm [shape: f32[16,32], index: 4, kind: input, shape index: {}]   ;;  %s2388_s5 = inlined_call_operand.vmem [shape: f32[1,32], index: 5, kind: input, shape index: {}]   ;;  %s2389_s6 = inlined_call_operand.hbm [shape: f32[8,32,32], index: 6, kind: input, shape index: {}]   ;;  %s2390_s7 = inlined_call_operand.vmem [shape: f32[1,32], index: 7, kind: input, shape index: {}]   ;;  %s2391_s8 = inlined_call_operand.hbm [shape: f32[2,32], index: 8, kind: output, shape index: {}]  }
   0x1   :  { %14 = vsyncpa [#allocation6], 0 }
   0x2   :  { %15 = vsyncpa [#allocation4], 0  ;;  %s2101_s27 = smov [#allocation2]   ;;  %s2029_s9 = scalar_lea.hbm %s2387_s4, 256 }
   0x3   :  { %s29_s28 = sshll.u32 %s2101_s27, 4  ;;  %p2030_p0 = scmp.ne.s32.totalorder %s2387_s4, %s2029_s9  ;;  %s30_s28 = int_to_ptr.vmem [resolvable:$true] %s29_s28 }
   0x4   :  { %p2033_p1 = scmp.lt.u32.totalorder %s2029_s9, %s2387_s4 }
   0x6   :  { %p2035_p2 = pnand %p2033_p1, %p2030_p0 }
   0x8   :  { %2038 = shalt.err (!%p2035_p2)
}
   0x9   :  { %s2039_s14 = scalar_lea.vmem %s30_s28, 256  ;;  %p2044_p4 = scmp.lt.s32.totalorder %s30_s28, %s30_s28 }
   0xa   :  { %p2040_p3 = scmp.ne.s32.totalorder %s30_s28, %s2039_s14  ;;  %p2045_p5 = scmp.lt.s32.totalorder %s2039_s14, %s2039_s14 }
   0xc   :  { %p2046_p6 = por %p2045_p5, %p2044_p4 }
   0xe   :  { %p2047_p7 = pnand %p2046_p6, %p2040_p3 }
  0x10   :  { %2050 = shalt.err (!%p2047_p7)
}
  0x11   :  { %s2102_s15 = smov 128   ;;  %s2103_s16 = smov 8  }
  0x12   :  { %35 = dma.hbm_to_vmem [thread:$0]  %s2387_s4, 256, %s30_s28, [#allocation3], %s2102_s15, %s2102_s15, %s2103_s16  }
  0x13   :  { %s2104_s19 = smov [#allocation5]   ;;  %s2051_s23 = scalar_lea.hbm %s2389_s6, 4096 }
  0x14   :  { %s43_s20 = sshll.u32 %s2104_s19, 4  ;;  %p2052_p8 = scmp.ne.s32.totalorder %s2389_s6, %s2051_s23  ;;  %s44_s20 = int_to_ptr.vmem [resolvable:$true] %s43_s20 }
  0x15   :  { %p2055_p9 = scmp.lt.u32.totalorder %s2051_s23, %s2389_s6 }
  0x17   :  { %p2057_p10 = pnand %p2055_p9, %p2052_p8 }
  0x19   :  { %2060 = shalt.err (!%p2057_p10)
}
  0x1a   :  { %s2061_s29 = scalar_lea.vmem %s44_s20, 4096  ;;  %p2066_p12 = scmp.lt.s32.totalorder %s44_s20, %s44_s20 }
  0x1b   :  { %p2062_p11 = scmp.ne.s32.totalorder %s44_s20, %s2061_s29  ;;  %p2067_p13 = scmp.lt.s32.totalorder %s2061_s29, %s2061_s29 }
  0x1d   :  { %p2068_p0 = por %p2067_p13, %p2066_p12 }
  0x1f   :  { %p2069_p1 = pnand %p2068_p0, %p2062_p11 }
  0x21   :  { %2072 = shalt.err (!%p2069_p1)
}
  0x22   :  { %49 = dma.hbm_to_vmem [thread:$0]  %s2389_s6, 4096, %s44_s20, [#allocation6], %s2102_s15, %s2102_s15, %s2103_s16  }
  0x23   :  { %2095 = dma.done.wait [#allocation3], 256  }
  0x24   :  { %2096 = vsyncadd [#allocation3], 4294967040 }
  0x25   :  { %2097 = dma.done.wait [#allocation6], 4096  }
  0x26   :  { %2098 = vsyncadd [#allocation6], 4294963200  ;;  %vm85_vm0 = vcmask 261120   ;;  %v60_v0 = vld [vmem:[%s2384_s1] sm:$0xff]  ;;  %v61_v1 = vld [vmem:[%s2384_s1 + $0x8] sm:$0xff]  ;;  %v2105_v11 = vmov 0.0|0.0   ;;  %v267_v45 = vlaneseq }
  0x27   :  { %v62_v2 = vld [vmem:[%s2384_s1 + $0x10] sm:$0xff]  ;;  %v2188_v3 = vpack.c.bf16 %v61_v1, %v60_v0  ;;  %v63_v4 = vld [vmem:[%s2384_s1 + $0x18] sm:$0xff]  ;;  %v58_v5 = vld [vmem:[%s2383_s0] sm:$0xff]  ;;  %1911 = vmatprep.subr.bf16.mxu1 %v2105_v11  ;;  %vm2106_vm1 = vmmov 0   ;;  %v2107_v14 = vmov 0.0   ;;  %vm169_vm2 = vcmask 130048  }
  0x28   :  { %v2196_v6 = vpack.c.bf16 %v63_v4, %v62_v2  ;;  %1736 = vmatprep.mubr.msk.f32.mxu0 %vm85_vm0, %v58_v5  ;;  %v59_v7 = vld [vmem:[%s2383_s0 + $0x8] sm:$0xff]  ;;  %v68_v8 = vld [vmem:[#allocation2] sm:$0xff]  ;;  %1743 = vmatprep.mubr.msk.f32.mxu1 %vm2106_vm1, %v2107_v14  ;;  %v66_v37 = vld [vmem:[%s2386_s3 + $0x10] sm:$0xff]  ;;  %vm189_vm3 = vcmask 1041409   ;;  %v2108_v43 = vmov 1966171168  }
  0x29   :  { %1904 = vmatprep.subr.bf16.mxu0 %v2188_v3  ;;  %v69_v9 = vld [vmem:[#allocation2 + $0x8] sm:$0xff]  ;;  %v64_v12 = vld [vmem:[%s2386_s3] sm:$0xff]  ;;  %v67_v38 = vld [vmem:[%s2386_s3 + $0x18] sm:$0xff]  ;;  %v265_v44 = vunpack.c.l.s4 %v2108_v43  ;;  %v268_v47 = vshrl.u32 %v267_v45, 7  ;;  %s2109_s29 = smov [#allocation7]   ;;  %vm1599_vm4 = vcmask 254976  }
  0x2a   :  { %1906 = vmatpush3.bf16.msra.mxu0 %v2188_v3  ;;  %v2211_v10 = vpack.c.bf16 %v69_v9, %v68_v8  ;;  %v65_v13 = vld [vmem:[%s2386_s3 + $0x8] sm:$0xff]  ;;  %v2230_v16 = vld [vmem:[%s2385_s2] ss:$0 sm:$0xff]  ;;  %v2242_v41 = vpack.c.bf16 %v67_v38, %v66_v37  ;;  %s1607_s4 = sshll.u32 %s2109_s29, 4  ;;  %s1608_s4 = int_to_ptr.vmem [resolvable:$true] %s1607_s4 }
  0x2b   :  { %1908 = vmatprep.subr.bf16.mxu0 %v2196_v6  ;;  %v2223_v15 = vpack.c.bf16 %v65_v13, %v64_v12  ;;  %v266_v46 = vunpack.c.0.s8 %v265_v44  ;;  %v2260_v54 = vsub.s32 0, %v268_v47  ;;  %v2267_v57 = vld [vmem:[%s2388_s5] ss:$0 sm:$0xff]  ;;  %s2073_s28 = scalar_lea.vmem %s1608_s4, 32  ;;  %p2078_p3 = scmp.lt.s32.totalorder %s1608_s4, %s1608_s4 }
  0x2c   :  { %1913 = vmatpush3.bf16.msra.mxu1 %v2211_v10  ;;  %p2074_p2 = scmp.ne.s32.totalorder %s1608_s4, %s2073_s28  ;;  %p2079_p4 = scmp.lt.s32.totalorder %s2073_s28, %s2073_s28 }
  0x2d   :  { %1915 = vmatprep.subr.bf16.mxu1 %v2223_v15  ;;  %v2256_v48 = vsub.s32 %v266_v46, %v268_v47 }
  0x2e   :  { %1910 = vmatpush3.bf16.msra.mxu0 %v2196_v6  ;;  %p2080_p5 = por %p2079_p4, %p2078_p3 }
  0x2f   :  { %1923 = vmatprep.subr.bf16.mxu0 %v2188_v3 }
  0x30   :  { %p2081_p6 = pnand %p2080_p5, %p2074_p2 }
  0x31   :  { %1737 = vmatmul.mubr.msk.f32.vlgmr.msra.gmra.mrb[0].mxu0 %vm85_vm0, %v59_v7 }
  0x32   :  { %1925 = vmatpush3.bf16.msra.mxu0 %v2188_v3 }
  0x33   :  { %1927 = vmatprep.subr.bf16.mxu0 %v2196_v6 }
  0x36   :  { %1929 = vmatpush3.bf16.msra.mxu0 %v2196_v6 }
  0x37   :  { %1934 = vmatprep.subr.bf16.mxu0 %v2223_v15 }
 0x104   :  { %v1738_v17 = vpop.f32.mrb[0].mxu0 }
 0x105   :  { %v164_v18 = vadd.f32 %v1738_v17, %v2230_v16  ;;  %v158_v19 = vpop.f32.mrb[1].mxu0 }
 0x106   :  { %v159_v20 = vadd.f32 %v2230_v16, %v158_v19 }
 0x107   :  { %v168_v21 = vmax.f32 %v164_v18, 0.0 }
 0x108   :  { %v167_v22 = vmax.f32 %v159_v20, 0.0 }
 0x109   :  { %v177_v23 = vsel %vm169_vm2, %v168_v21, 0.0 }
 0x10a   :  { %v178_v24 = vrot.slane %v177_v23, 4  ;;  %v170_v25 = vsel %vm169_vm2, %v167_v22, 0.0 }
 0x10b   :  { %v171_v26 = vrot.slane %v170_v25, 4 }
 0x10c   :  { %v179_v27 = vadd.f32 %v178_v24, %v177_v23 }
 0x10d   :  { %v172_v28 = vadd.f32 %v171_v26, %v170_v25 }
 0x10e   :  { %v180_v29 = vrot.slane %v179_v27, 2 }
 0x10f   :  { %v173_v30 = vrot.slane %v172_v28, 2 }
 0x110   :  { %v181_v31 = vadd.f32 %v180_v29, %v179_v27 }
 0x111   :  { %v174_v32 = vadd.f32 %v173_v30, %v172_v28 }
 0x112   :  { %v182_v33 = vrot.slane %v181_v31, 1 }
 0x113   :  { %v175_v34 = vrot.slane %v174_v32, 1 }
 0x114   :  { %v183_v35 = vadd.f32 %v182_v33, %v181_v31 }
 0x115   :  { %v176_v36 = vadd.f32 %v175_v34, %v174_v32 }
 0x116   :  { %v186_v39 = vmul.f32 0.125, %v183_v35 }
 0x117   :  { %v185_v40 = vmul.f32 0.125, %v176_v36 }
 0x119   :  { %v190_v42 = vsel %vm189_vm3, %v186_v39, %v185_v40 }
 0x11a   :  { %1744 = vmatmul.mubr.msk.f32.vlgmr.msra.gmra.mrb[0].mxu1 %vm169_vm2, %v190_v42 }
 0x11b   :  { %1917 = vmatpush3.bf16.msra.mxu1 %v2223_v15  ;;  %1754 = vmatprep.mubr.msk.f32.mxu1 %vm85_vm0, %v58_v5 }
 0x11c   :  { %1919 = vmatprep.subr.bf16.mxu1 %v2242_v41 }
 0x11f   :  { %1921 = vmatpush3.bf16.msra.mxu1 %v2242_v41 }
 0x120   :  { %1930 = vmatprep.subr.bf16.mxu1 %v2105_v11 }
 0x122   :  { %1755 = vmatmul.mubr.msk.f32.vlgmr.msra.gmra.mrb[2].mxu1 %vm85_vm0, %v59_v7 }
 0x123   :  { %1932 = vmatpush3.bf16.msra.mxu1 %v2211_v10  ;;  %1772 = vmatprep.mubr.msk.f32.mxu1 %vm2106_vm1, %v2107_v14 }
 0x124   :  { %1942 = vmatprep.subr.bf16.mxu1 %v2188_v3 }
 0x1ed   :  { %v259_v49 = vpop.f32.mrb[0].mxu1 }
 0x1ee   :  { %v270_v50 = vrot.slane %v259_v49, %v2256_v48  ;;  %v1745_v51 = vpop.f32.mrb[1].mxu1 }
 0x1f0   :  { %v271_v52 = vcombine.high %v270_v50, %v270_v50  ;;  %v278_v53 = vrot.slane %v270_v50, %v2256_v48 }
 0x1f2   :  { %v285_v55 = vrot.slane %v271_v52, %v2256_v48  ;;  %v289_v59 = vrot.slane %v278_v53, %v2260_v54 }
 0x1f4   :  { %v293_v56 = vrot.slane %v285_v55, %v2260_v54 }
 0x1f5   :  { %v1756_v58 = vpop.f32.mrb[2].mxu1 }
 0x1f6   :  { %v368_v60 = vadd.f32 %v1756_v58, %v293_v56  ;;  %v362_v61 = vpop.f32.mrb[3].mxu1 }
 0x1f7   :  { %v363_v62 = vadd.f32 %v362_v61, %v289_v59 }
 0x1f8   :  { %v372_v63 = vadd.f32 %v2267_v57, %v368_v60 }
 0x1f9   :  { %v371_v0 = vadd.f32 %v2267_v57, %v363_v62 }
 0x1fa   :  { %2017 = vtanh.f32 %v372_v63 }
 0x1fb   :  { %2019 = vtanh.f32 %v371_v0 }
 0x204   :  { %v2018_v1 = vpop.eup %2017 }
 0x205   :  { %v2020_v2 = vpop.eup %2019 }
 0x206   :  { %1765 = vmatprep.mubr.msk.f32.mxu0 %vm85_vm0, %v2020_v2 }
 0x207   :  { %1766 = vmatmul.mubr.msk.f32.vlgmr.msra.gmra.mrb[2].mxu0 %vm85_vm0, %v2018_v1 }
 0x208   :  { %1936 = vmatpush3.bf16.msra.mxu0 %v2223_v15  ;;  %1783 = vmatprep.mubr.msk.f32.mxu0 %vm85_vm0, %v2020_v2 }
 0x209   :  { %1938 = vmatprep.subr.bf16.mxu0 %v2242_v41 }
 0x20c   :  { %1940 = vmatpush3.bf16.msra.mxu0 %v2242_v41 }
 0x20d   :  { %1949 = vmatprep.subr.bf16.mxu0 %v2105_v11 }
 0x20f   :  { %1784 = vmatmul.mubr.msk.f32.vlgmr.msra.gmra.mrb[4].mxu0 %vm85_vm0, %v2018_v1 }
 0x210   :  { %1951 = vmatpush3.bf16.msra.mxu0 %v2211_v10  ;;  %1801 = vmatprep.mubr.msk.f32.mxu0 %vm2106_vm1, %v2107_v14 }
 0x211   :  { %1960 = vmatprep.subr.bf16.mxu0 %v2105_v11 }
 0x2da   :  { %v1767_v4 = vpop.f32.mrb[2].mxu0 }
 0x2db   :  { %v453_v5 = vadd.f32 %v1767_v4, %v2230_v16  ;;  %v447_v7 = vpop.f32.mrb[3].mxu0 }
 0x2dc   :  { %v448_v8 = vadd.f32 %v2230_v16, %v447_v7 }
 0x2dd   :  { %v457_v9 = vmax.f32 %v453_v5, 0.0 }
 0x2de   :  { %v456_v12 = vmax.f32 %v448_v8, 0.0 }
 0x2df   :  { %v465_v13 = vsel %vm169_vm2, %v457_v9, 0.0 }
 0x2e0   :  { %v466_v17 = vrot.slane %v465_v13, 4  ;;  %v458_v18 = vsel %vm169_vm2, %v456_v12, 0.0  ;;  %v952_v12 = vld [vmem:[#allocation5 + $0x20] sm:$0xff] }
 0x2e1   :  { %v459_v19 = vrot.slane %v458_v18, 4 }
 0x2e2   :  { %v467_v10 = vadd.f32 %v466_v17, %v465_v13  ;;  %v1785_v20 = vpop.f32.mrb[4].mxu0  ;;  %v953_v13 = vld [vmem:[#allocation5 + $0x28] sm:$0xff]  ;;  %v947_v17 = vld [vmem:[#allocation5] sm:$0xff] }
 0x2e3   :  { %v460_v21 = vadd.f32 %v459_v19, %v458_v18  ;;  %v648_v22 = vpop.f32.mrb[5].mxu0  ;;  %v1961_v18 = vpack.c.bf16 %v953_v13, %v952_v12  ;;  %v948_v19 = vld [vmem:[#allocation5 + $0x8] sm:$0xff]  ;;  %v1350_v12 = vld [vmem:[#allocation5 + $0xa0] sm:$0xff] }
 0x2e4   :  { %v468_v23 = vrot.slane %v467_v10, 2  ;;  %v1351_v13 = vld [vmem:[#allocation5 + $0xa8] sm:$0xff] }
 0x2e5   :  { %v461_v24 = vrot.slane %v460_v21, 2 }
 0x2e6   :  { %v469_v25 = vadd.f32 %v468_v23, %v467_v10  ;;  %v954_v10 = vld [vmem:[#allocation5 + $0x30] sm:$0xff]  ;;  %v950_v23 = vld [vmem:[#allocation5 + $0x18] sm:$0xff] }
 0x2e7   :  { %v462_v26 = vadd.f32 %v461_v24, %v460_v21  ;;  %v1967_v21 = vpack.c.bf16 %v948_v19, %v947_v17  ;;  %v1272_v19 = vld [vmem:[#allocation5 + $0x98] sm:$0xff] }
 0x2e8   :  { %v470_v27 = vrot.slane %v469_v25, 1 }
 0x2e9   :  { %v463_v28 = vrot.slane %v462_v26, 1 }
 0x2ea   :  { %v471_v29 = vadd.f32 %v470_v27, %v469_v25 }
 0x2eb   :  { %v464_v30 = vadd.f32 %v463_v28, %v462_v26 }
 0x2ec   :  { %v473_v31 = vmul.f32 0.125, %v471_v29 }
 0x2ed   :  { %v472_v32 = vmul.f32 0.125, %v464_v30 }
 0x2ef   :  { %v476_v33 = vsel %vm189_vm3, %v473_v31, %v472_v32 }
 0x2f0   :  { %1773 = vmatmul.mubr.msk.f32.vlgmr.msra.gmra.mrb[4].mxu1 %vm169_vm2, %v476_v33 }
 0x2f1   :  { %1944 = vmatpush3.bf16.msra.mxu1 %v2188_v3 }
 0x2f2   :  { %1946 = vmatprep.subr.bf16.mxu1 %v2196_v6 }
 0x2f5   :  { %1948 = vmatpush3.bf16.msra.mxu1 %v2196_v6 }
 0x2f6   :  { %1953 = vmatprep.subr.bf16.mxu1 %v2223_v15 }
 0x3c3   :  { %v545_v34 = vpop.f32.mrb[4].mxu1 }
 0x3c4   :  { %v556_v35 = vrot.slane %v545_v34, %v2256_v48  ;;  %v1774_v36 = vpop.f32.mrb[5].mxu1 }
 0x3c6   :  { %v557_v37 = vcombine.high %v556_v35, %v556_v35  ;;  %v564_v38 = vrot.slane %v556_v35, %v2256_v48 }
 0x3c8   :  { %v571_v39 = vrot.slane %v557_v37, %v2256_v48  ;;  %v575_v40 = vrot.slane %v564_v38, %v2260_v54  ;;  %v1107_v38 = vld [vmem:[#allocation5 + $0x40] sm:$0xff] }
 0x3ca   :  { %v579_v42 = vrot.slane %v571_v39, %v2260_v54  ;;  %v649_v3 = vadd.f32 %v648_v22, %v575_v40  ;;  %v949_v22 = vld [vmem:[#allocation5 + $0x10] sm:$0xff]  ;;  %v1108_v39 = vld [vmem:[#allocation5 + $0x48] sm:$0xff]  ;;  %v1188_v40 = vld [vmem:[#allocation5 + $0x60] sm:$0xff] }
 0x3cb   :  { %v1970_v25 = vpack.c.bf16 %v950_v23, %v949_v22  ;;  %v1431_v23 = vld [vmem:[#allocation5 + $0xc0] sm:$0xff] }
 0x3cc   :  { %v654_v43 = vadd.f32 %v1785_v20, %v579_v42  ;;  %v657_v44 = vadd.f32 %v2267_v57, %v649_v3  ;;  %v955_v20 = vld [vmem:[#allocation5 + $0x38] sm:$0xff]  ;;  %v1189_v42 = vld [vmem:[#allocation5 + $0x68] sm:$0xff]  ;;  %v1109_v3 = vld [vmem:[#allocation5 + $0x50] sm:$0xff] }
 0x3cd   :  { %v1964_v24 = vpack.c.bf16 %v955_v20, %v954_v10  ;;  %v1991_v10 = vpack.c.bf16 %v1351_v13, %v1350_v12  ;;  %v1352_v20 = vld [vmem:[#allocation5 + $0xb0] sm:$0xff] }
 0x3ce   :  { %v658_v6 = vadd.f32 %v2267_v57, %v654_v43  ;;  %2021 = vtanh.f32 %v657_v44  ;;  %v1110_v43 = vld [vmem:[#allocation5 + $0x58] sm:$0xff] }
 0x3d0   :  { %2023 = vtanh.f32 %v658_v6 }
 0x3d8   :  { %v2022_v45 = vpop.eup %2021 }
 0x3d9   :  { %1794 = vmatprep.mubr.msk.f32.mxu1 %vm85_vm0, %v2022_v45 }
 0x3da   :  { %v2024_v46 = vpop.eup %2023 }
 0x3db   :  { %1795 = vmatmul.mubr.msk.f32.vlgmr.msra.gmra.mrb[6].mxu1 %vm85_vm0, %v2024_v46 }
 0x3dc   :  { %1955 = vmatpush3.bf16.msra.mxu1 %v2223_v15  ;;  %1812 = vmatprep.mubr.msk.f32.mxu1 %vm85_vm0, %v2022_v45  ;;  %v1979_v45 = vpack.c.bf16 %v1189_v42, %v1188_v40 }
 0x3dd   :  { %1957 = vmatprep.subr.bf16.mxu1 %v2242_v41 }
 0x3e0   :  { %1959 = vmatpush3.bf16.msra.mxu1 %v2242_v41 }
 0x3e1   :  { %1966 = vmatprep.subr.bf16.mxu1 %v2105_v11 }
 0x3e3   :  { %1813 = vmatmul.mubr.msk.f32.vlgmr.msra.gmra.mrb[8].mxu1 %vm85_vm0, %v2024_v46  ;;  %v1976_v46 = vpack.c.bf16 %v1110_v43, %v1109_v3 }
 0x3e4   :  { %1834 = vmatprep.mubr.msk.f32.mxu1 %vm2106_vm1, %v2107_v14  ;;  %1968 = vmatpush3.bf16.msra.mxu1 %v1967_v21  ;;  %v1353_v21 = vld [vmem:[#allocation5 + $0xb8] sm:$0xff] }
 0x3e5   :  { %1969 = vmatprep.subr.bf16.mxu1 %v2105_v11 }
 0x3e8   :  { %1971 = vmatpush3.bf16.msra.mxu1 %v1970_v25  ;;  %v1994_v25 = vpack.c.bf16 %v1353_v21, %v1352_v20 }
 0x3e9   :  { %1978 = vmatprep.subr.bf16.mxu1 %v2105_v11 }
 0x4ae   :  { %v1796_v47 = vpop.f32.mrb[6].mxu1 }
 0x4af   :  { %v739_v49 = vadd.f32 %v1796_v47, %v2230_v16  ;;  %v733_v50 = vpop.f32.mrb[7].mxu1 }
 0x4b0   :  { %v734_v51 = vadd.f32 %v2230_v16, %v733_v50 }
 0x4b1   :  { %v743_v15 = vmax.f32 %v739_v49, 0.0 }
 0x4b2   :  { %v742_v52 = vmax.f32 %v734_v51, 0.0 }
 0x4b3   :  { %v751_v53 = vsel %vm169_vm2, %v743_v15, 0.0 }
 0x4b4   :  { %v752_v55 = vrot.slane %v751_v53, 4  ;;  %v744_v41 = vsel %vm169_vm2, %v742_v52, 0.0 }
 0x4b5   :  { %v745_v56 = vrot.slane %v744_v41, 4 }
 0x4b6   :  { %v753_v58 = vadd.f32 %v752_v55, %v751_v53  ;;  %v1814_v59 = vpop.f32.mrb[8].mxu1 }
 0x4b7   :  { %v746_v60 = vadd.f32 %v745_v56, %v744_v41  ;;  %v934_v61 = vpop.f32.mrb[9].mxu1  ;;  %v1190_v41 = vld [vmem:[#allocation5 + $0x70] sm:$0xff]  ;;  %v1191_v56 = vld [vmem:[#allocation5 + $0x78] sm:$0xff] }
 0x4b8   :  { %v754_v62 = vrot.slane %v753_v58, 2 }
 0x4b9   :  { %v747_v63 = vrot.slane %v746_v60, 2 }
 0x4ba   :  { %v755_v0 = vadd.f32 %v754_v62, %v753_v58 }
 0x4bb   :  { %v748_v1 = vadd.f32 %v747_v63, %v746_v60 }
 0x4bc   :  { %v756_v2 = vrot.slane %v755_v0, 1 }
 0x4bd   :  { %v749_v4 = vrot.slane %v748_v1, 1 }
 0x4be   :  { %v757_v5 = vadd.f32 %v756_v2, %v755_v0  ;;  %v1269_v2 = vld [vmem:[#allocation5 + $0x80] sm:$0xff] }
 0x4bf   :  { %v750_v16 = vadd.f32 %v749_v4, %v748_v1  ;;  %v1270_v4 = vld [vmem:[#allocation5 + $0x88] sm:$0xff] }
 0x4c0   :  { %v759_v7 = vmul.f32 0.125, %v757_v5  ;;  %v1985_v17 = vpack.c.bf16 %v1270_v4, %v1269_v2 }
 0x4c1   :  { %v758_v8 = vmul.f32 0.125, %v750_v16 }
 0x4c3   :  { %v762_v9 = vsel %vm189_vm3, %v759_v7, %v758_v8  ;;  %v1982_v8 = vpack.c.bf16 %v1191_v56, %v1190_v41 }
 0x4c4   :  { %1802 = vmatmul.mubr.msk.f32.vlgmr.msra.gmra.mrb[6].mxu0 %vm169_vm2, %v762_v9 }
 0x4c5   :  { %1823 = vmatprep.mubr.msk.f32.mxu0 %vm2106_vm1, %v2107_v14  ;;  %1962 = vmatpush3.bf16.msra.mxu0 %v1961_v18  ;;  %v1271_v18 = vld [vmem:[#allocation5 + $0x90] sm:$0xff] }
 0x4c6   :  { %1963 = vmatprep.subr.bf16.mxu0 %v2105_v11  ;;  %v1988_v22 = vpack.c.bf16 %v1272_v19, %v1271_v18 }
 0x4c9   :  { %1965 = vmatpush3.bf16.msra.mxu0 %v1964_v24  ;;  %v1432_v24 = vld [vmem:[#allocation5 + $0xc8] sm:$0xff] }
 0x4ca   :  { %1972 = vmatprep.subr.bf16.mxu0 %v2105_v11 }
 0x597   :  { %v831_v26 = vpop.f32.mrb[6].mxu0 }
 0x598   :  { %v842_v27 = vrot.slane %v831_v26, %v2256_v48  ;;  %v1803_v28 = vpop.f32.mrb[7].mxu0  ;;  %v1512_v26 = vld [vmem:[#allocation5 + $0xe0] sm:$0xff] }
 0x599   :  { %v1997_v28 = vpack.c.bf16 %v1432_v24, %v1431_v23 }
 0x59a   :  { %v843_v29 = vcombine.high %v842_v27, %v842_v27  ;;  %v850_v30 = vrot.slane %v842_v27, %v2256_v48  ;;  %v1513_v27 = vld [vmem:[#allocation5 + $0xe8] sm:$0xff] }
 0x59c   :  { %v857_v31 = vrot.slane %v843_v29, %v2256_v48  ;;  %v861_v32 = vrot.slane %v850_v30, %v2260_v54  ;;  %v1973_v48 = vpack.c.bf16 %v1108_v39, %v1107_v38  ;;  %v1433_v29 = vld [vmem:[#allocation5 + $0xd0] sm:$0xff]  ;;  %v1434_v30 = vld [vmem:[#allocation5 + $0xd8] sm:$0xff] }
 0x59e   :  { %v865_v33 = vrot.slane %v857_v31, %v2260_v54  ;;  %v935_v34 = vadd.f32 %v934_v61, %v861_v32  ;;  %v2003_v31 = vpack.c.bf16 %v1513_v27, %v1512_v26  ;;  %v1514_v32 = vld [vmem:[#allocation5 + $0xf0] sm:$0xff] }
 0x5a0   :  { %v940_v35 = vadd.f32 %v1814_v59, %v865_v33  ;;  %v943_v36 = vadd.f32 %v2267_v57, %v935_v34  ;;  %v1515_v33 = vld [vmem:[#allocation5 + $0xf8] sm:$0xff]  ;;  %v2000_v34 = vpack.c.bf16 %v1434_v30, %v1433_v29 }
 0x5a2   :  { %v944_v37 = vadd.f32 %v2267_v57, %v940_v35  ;;  %2025 = vtanh.f32 %v943_v36  ;;  %v2006_v35 = vpack.c.bf16 %v1515_v33, %v1514_v32 }
 0x5a4   :  { %2027 = vtanh.f32 %v944_v37 }
 0x5ac   :  { %v2026_v44 = vpop.eup %2025 }
 0x5ad   :  { %v958_v6 = vrot.slane %v2026_v44, 1  ;;  %v1111_v54 = vrot.slane %v2026_v44, 2  ;;  %v1192_v49 = vrot.slane %v2026_v44, 3  ;;  %v1273_v50 = vrot.slane %v2026_v44, 4 }
 0x5ae   :  { %v2028_v47 = vpop.eup %2027  ;;  %v1354_v51 = vrot.slane %v2026_v44, 5  ;;  %v1435_v15 = vrot.slane %v2026_v44, 6  ;;  %v1516_v1 = vrot.slane %v2026_v44, 7 }
 0x5af   :  { %v959_v57 = vsel %vm189_vm3, %v2028_v47, %v958_v6  ;;  %v1032_v52 = vrot.slane %v2028_v47, 7  ;;  %v1112_v53 = vrot.slane %v2028_v47, 1  ;;  %v1193_v55 = vrot.slane %v2028_v47, 2 }
 0x5b0   :  { %1824 = vmatmul.mubr.msk.f32.vlgmr.msra.gmra.mrb[8].mxu0 %vm85_vm0, %v959_v57  ;;  %v1274_v58 = vrot.slane %v2028_v47, 3  ;;  %v1355_v59 = vrot.slane %v2028_v47, 4  ;;  %v1436_v60 = vrot.slane %v2028_v47, 5  ;;  %v1517_v61 = vrot.slane %v2028_v47, 6 }
 0x5b1   :  { %1974 = vmatpush3.bf16.msra.mxu0 %v1973_v48  ;;  %v1033_v62 = vsel %vm189_vm3, %v1032_v52, %v2026_v44  ;;  %1845 = vmatprep.mubr.msk.f32.mxu0 %vm2106_vm1, %v2107_v14  ;;  %v1113_v63 = vsel %vm189_vm3, %v1112_v53, %v1111_v54  ;;  %v1194_v0 = vsel %vm189_vm3, %v1193_v55, %v1192_v49 }
 0x5b2   :  { %1835 = vmatmul.mubr.msk.f32.vlgmr.msra.gmra.mrb[10].mxu1 %vm85_vm0, %v1033_v62  ;;  %1975 = vmatprep.subr.bf16.mxu0 %v2105_v11  ;;  %v1275_v5 = vsel %vm189_vm3, %v1274_v58, %v1273_v50  ;;  %v1356_v16 = vsel %vm189_vm3, %v1355_v59, %v1354_v51  ;;  %v1437_v7 = vsel %vm189_vm3, %v1436_v60, %v1435_v15  ;;  %v1642_v15 = vld [vmem:[%s2390_s7] ss:$0 sm:$0xff] }
 0x5b3   :  { %1980 = vmatpush3.bf16.msra.mxu1 %v1979_v45  ;;  %1856 = vmatprep.mubr.msk.f32.mxu1 %vm2106_vm1, %v2107_v14  ;;  %v1518_v9 = vsel %vm189_vm3, %v1517_v61, %v1516_v1 }
 0x5b4   :  { %1981 = vmatprep.subr.bf16.mxu1 %v2105_v11 }
 0x5b5   :  { %1977 = vmatpush3.bf16.msra.mxu0 %v1976_v46 }
 0x5b6   :  { %1984 = vmatprep.subr.bf16.mxu0 %v2105_v11 }
 0x5b7   :  { %1983 = vmatpush3.bf16.msra.mxu1 %v1982_v8 }
 0x5b8   :  { %1846 = vmatmul.mubr.msk.f32.vlgmr.msra.gmra.mrb[10].mxu0 %vm85_vm0, %v1113_v63  ;;  %1990 = vmatprep.subr.bf16.mxu1 %v2105_v11 }
 0x5b9   :  { %1986 = vmatpush3.bf16.msra.mxu0 %v1985_v17  ;;  %1867 = vmatprep.mubr.msk.f32.mxu0 %vm2106_vm1, %v2107_v14 }
 0x5ba   :  { %1857 = vmatmul.mubr.msk.f32.vlgmr.msra.gmra.mrb[12].mxu1 %vm85_vm0, %v1194_v0  ;;  %1987 = vmatprep.subr.bf16.mxu0 %v2105_v11 }
 0x5bb   :  { %1992 = vmatpush3.bf16.msra.mxu1 %v1991_v10  ;;  %1878 = vmatprep.mubr.msk.f32.mxu1 %vm2106_vm1, %v2107_v14 }
 0x5bc   :  { %1993 = vmatprep.subr.bf16.mxu1 %v2105_v11 }
 0x5bd   :  { %1989 = vmatpush3.bf16.msra.mxu0 %v1988_v22 }
 0x5be   :  { %1996 = vmatprep.subr.bf16.mxu0 %v2105_v11 }
 0x5bf   :  { %1995 = vmatpush3.bf16.msra.mxu1 %v1994_v25 }
 0x5c0   :  { %1868 = vmatmul.mubr.msk.f32.vlgmr.msra.gmra.mrb[12].mxu0 %vm85_vm0, %v1275_v5  ;;  %2002 = vmatprep.subr.bf16.mxu1 %v2105_v11 }
 0x5c1   :  { %1998 = vmatpush3.bf16.msra.mxu0 %v1997_v28  ;;  %1889 = vmatprep.mubr.msk.f32.mxu0 %vm2106_vm1, %v2107_v14 }
 0x5c2   :  { %1879 = vmatmul.mubr.msk.f32.vlgmr.msra.gmra.mrb[14].mxu1 %vm85_vm0, %v1356_v16  ;;  %1999 = vmatprep.subr.bf16.mxu0 %v2105_v11 }
 0x5c3   :  { %2004 = vmatpush3.bf16.msra.mxu1 %v2003_v31  ;;  %1900 = vmatprep.mubr.msk.f32.mxu1 %vm2106_vm1, %v2107_v14 }
 0x5c4   :  { %2005 = vmatprep.subr.bf16.mxu1 %v2105_v11 }
 0x5c5   :  { %2001 = vmatpush3.bf16.msra.mxu0 %v2000_v34 }
 0x5c7   :  { %2007 = vmatpush3.bf16.msra.mxu1 %v2006_v35 }
 0x5c8   :  { %1890 = vmatmul.mubr.msk.f32.vlgmr.msra.gmra.mrb[14].mxu0 %vm85_vm0, %v1437_v7 }
 0x5ca   :  { %1901 = vmatmul.mubr.msk.f32.vlgmr.msra.gmra.mrb[16].mxu1 %vm85_vm0, %v1518_v9 }
 0x683   :  { %v1028_v36 = vpop.f32.mrb[8].mxu0 }
 0x684   :  { %v1825_v37 = vpop.f32.mrb[9].mxu0 }
 0x685   :  { %v1102_v38 = vpop.f32.mrb[10].mxu1 }
 0x686   :  { %v1103_v39 = vadd.f32 %v1102_v38, %v1028_v36  ;;  %v1836_v40 = vpop.f32.mrb[11].mxu1 }
 0x68b   :  { %v1182_v42 = vpop.f32.mrb[10].mxu0 }
 0x68c   :  { %v1186_v3 = vadd.f32 %v1182_v42, %v1103_v39  ;;  %v1847_v43 = vpop.f32.mrb[11].mxu0 }
 0x68d   :  { %v1263_v44 = vpop.f32.mrb[12].mxu1 }
 0x68e   :  { %v1267_v48 = vadd.f32 %v1263_v44, %v1186_v3  ;;  %v1858_v6 = vpop.f32.mrb[13].mxu1 }
 0x693   :  { %v1344_v14 = vpop.f32.mrb[12].mxu0 }
 0x694   :  { %v1348_v45 = vadd.f32 %v1344_v14, %v1267_v48  ;;  %v1869_v11 = vpop.f32.mrb[13].mxu0 }
 0x695   :  { %v1425_v46 = vpop.f32.mrb[14].mxu1 }
 0x696   :  { %v1429_v54 = vadd.f32 %v1425_v46, %v1348_v45  ;;  %v1880_v47 = vpop.f32.mrb[15].mxu1 }
 0x69b   :  { %v1506_v49 = vpop.f32.mrb[14].mxu0 }
 0x69c   :  { %v1510_v50 = vadd.f32 %v1506_v49, %v1429_v54  ;;  %v1891_v51 = vpop.f32.mrb[15].mxu0 }
 0x69d   :  { %v1587_v57 = vpop.f32.mrb[16].mxu1 }
 0x69e   :  { %v1591_v52 = vadd.f32 %v1587_v57, %v1510_v50  ;;  %v1902_v53 = vpop.f32.mrb[17].mxu1 }
 0x6a0   :  { %v1598_v55 = vadd.f32 %v1642_v15, %v1591_v52 }
 0x6a2   :  { %1600 = vst.msk [vmem:[#allocation7] sm:$0x3] %vm1599_vm4, %v1598_v55 }
 0x6a3   :  { %2084 = shalt.err (!%p2081_p6)
}
 0x6a4   :  { %s2085_s7 = scalar_lea.hbm %s2391_s8, 32 }
 0x6a5   :  { %p2086_p7 = scmp.ne.s32.totalorder %s2391_s8, %s2085_s7  ;;  %p2089_p8 = scmp.lt.u32.totalorder %s2085_s7, %s2391_s8 }
 0x6a7   :  { %p2091_p9 = pnand %p2089_p8, %p2086_p7 }
 0x6a9   :  { %2094 = shalt.err (!%p2091_p9)
}
 0x6aa   :  { %1610 = dma.vmem_to_hbm [thread:$0]  %s1608_s4, 32, %s2391_s8, [#allocation4]  }
 0x6ab   :  { %2099 = dma.done.wait [#allocation4], 32  }
 0x6ac   :  { %2100 = vsyncadd [#allocation4], 4294967264 }
 0x6ad   :  { %1614 = vsyncpa [#allocation3], 1 }
 0x6ae   :  { %1615 = vsyncpa [#allocation6], 1 }
 0x6af   :  { %1616 = vsyncpa [#allocation4], 1 }

</bundles_post_ra>
